<compile_context>
chip_gen: v5e
topology: v5e:2x2
jax: 0.10.0
libtpu: 0.0.40
codegen_flags: <defaults>
</compile_context>

<pallas_src>
import functools

import jax
import jax.numpy as jnp
from jax.experimental import pallas as pl
from jax.experimental.pallas import tpu as pltpu


def _round_up(x, m):
    return ((x + m - 1) // m) * m


def _chip_defaults():
    """Per-generation tiling / VMEM defaults (conservative fallback if unknown)."""
    kind = ""
    try:
        kind = jax.devices()[0].device_kind.lower()
    except Exception:
        pass
    if "v7" in kind:   # 64 MiB VMEM per TC, 2 TCs/chip
        return {"block_b": 256, "vmem_cap": 48 << 20, "min_batch_tiles": 2}
    if "v6" in kind:   # 128 MiB VMEM, 1 TC
        return {"block_b": 512, "vmem_cap": 100 << 20, "min_batch_tiles": 1}
    if "v5" in kind:   # 128 MiB VMEM, 1 TC, lower HBM BW
        return {"block_b": 256, "vmem_cap": 100 << 20, "min_batch_tiles": 1}
    return {"block_b": 256, "vmem_cap": 48 << 20, "min_batch_tiles": 1}


_CHIP = _chip_defaults()


def mlp_kernel(x_ref, w0_ref, b0_ref, w1_ref, b1_ref, w2_ref, b2_ref, o_ref):
    # X = relu(dense0(X.float()))  -- bf16 MXU operands, f32 accumulate + bias.
    x = x_ref[...]  # (bb, d_in) bf16
    h0 = jnp.dot(x, w0_ref[...], preferred_element_type=jnp.float32) + b0_ref[...]
    h0 = jnp.maximum(h0, 0.0).astype(jnp.bfloat16)

    # X = dropout(X)  -- nn.Dropout is identity in eval-mode forward.
    # TODO(synk): training-mode dropout (pltpu.prng_seed/prng_random_bits mask +
    # 1/(1-p) scale) intentionally not implemented; eval semantics only.

    # X = relu(dense1(X))
    h1 = jnp.dot(h0, w1_ref[...], preferred_element_type=jnp.float32) + b1_ref[...]
    h1 = jnp.maximum(h1, 0.0).astype(jnp.bfloat16)

    # X = output(X)
    o_ref[...] = (
        jnp.dot(h1, w2_ref[...], preferred_element_type=jnp.float32) + b2_ref[...]
    ).astype(o_ref.dtype)


def prepare_params(w0, b0, w1, b1, w2, b2):
    """One-time weight staging: zero-pad every feature dim to a multiple of 128
    (lane-dense, mathematically exact for Linear+ReLU) and cast weights to bf16.
    Done ONCE so the per-call forward reads only the padded bf16 copies from HBM.

    Returns (padded_params_tuple, num_classes)."""
    input_dim, num_units = w0.shape
    num_classes = w2.shape[1]
    d_in = _round_up(input_dim, 128)
    d_h = _round_up(num_units, 128)
    d_out = _round_up(num_classes, 128)

    w0p = jnp.pad(w0.astype(jnp.bfloat16), ((0, d_in - input_dim), (0, d_h - num_units)))
    b0p = jnp.pad(b0.astype(jnp.float32), ((0, 0), (0, d_h - num_units)))
    w1p = jnp.pad(w1.astype(jnp.bfloat16), ((0, d_h - num_units), (0, d_h - num_units)))
    b1p = jnp.pad(b1.astype(jnp.float32), ((0, 0), (0, d_h - num_units)))
    w2p = jnp.pad(w2.astype(jnp.bfloat16), ((0, d_h - num_units), (0, d_out - num_classes)))
    b2p = jnp.pad(b2.astype(jnp.float32), ((0, 0), (0, d_out - num_classes)))
    return (w0p, b0p, w1p, b1p, w2p, b2p), num_classes


@functools.partial(jax.jit, static_argnames=("num_classes", "block_b", "out_dtype"))
def mlp_forward(x, padded_params, num_classes, *, block_b=None, out_dtype=jnp.float32):
    """Fused 3-layer MLP forward.

    x             : (B, input_dim), any float dtype
    padded_params : output of prepare_params() (pre-padded bf16 weights, f32 biases)
    returns       : (B, num_classes) in out_dtype (default float32)
    """
    w0p, b0p, w1p, b1p, w2p, b2p = padded_params
    B, input_dim = x.shape
    d_in = w0p.shape[0]
    d_h = w0p.shape[1]
    d_out = w2p.shape[1]

    if block_b is None:
        block_b = _CHIP["block_b"]
    min_tiles = _CHIP["min_batch_tiles"]

    # Balanced batch tiling: bb ~= ceil(B/num_tiles) rounded to the sublane (8),
    # so B just above a tile boundary doesn't pad up to a full extra tile.
    # On dual-TC chips (v7x) force >=2 grid steps when the batch is big enough.
    B8 = _round_up(B, 8)
    num_tiles = pl.cdiv(B8, block_b)
    if min_tiles > 1 and B8 >= min_tiles * 8:
        num_tiles = max(num_tiles, min_tiles)
    bb = _round_up(pl.cdiv(B8, num_tiles), 8)
    b_pad = num_tiles * bb

    xp = x.astype(jnp.bfloat16)
    if b_pad != B or d_in != input_dim:
        xp = jnp.pad(xp, ((0, b_pad - B), (0, d_in - input_dim)))

    out_itemsize = jnp.dtype(out_dtype).itemsize
    # VMEM budget: single-buffered resident weights + double-buffered x/out tiles
    # + peak live activations (h0_f32 + h0_bf16 + h1_f32 ~= 10 B/elem), 2x headroom,
    # capped per chip generation (v7x has only 64 MiB physical VMEM per TC).
    weight_bytes = (d_in * d_h + d_h * d_h + d_h * d_out) * 2 + (2 * d_h + d_out) * 4
    tile_bytes = 2 * bb * d_in * 2 + 2 * bb * d_out * out_itemsize
    act_bytes = bb * d_h * (4 + 2 + 4)
    vmem_limit = int(min(max(2 * (weight_bytes + tile_bytes + act_bytes), 32 << 20),
                         _CHIP["vmem_cap"]))
    # TODO(synk): for very large num_units (w1 alone >= ~32 MiB in bf16) the three
    # weights no longer fit resident; stream them over a K grid axis instead.

    def const_spec(shape):
        # Constant block index across the whole grid -> fetched once; single-buffer
        # to halve resident weight VMEM.
        return pl.BlockSpec(shape, lambda i: (0, 0), pipeline_mode=pl.Buffered(1))

    out = pl.pallas_call(
        mlp_kernel,
        out_shape=jax.ShapeDtypeStruct((b_pad, d_out), out_dtype),
        grid_spec=pltpu.PrefetchScalarGridSpec(
            num_scalar_prefetch=0,
            grid=(num_tiles,),
            in_specs=[
                pl.BlockSpec((bb, d_in), lambda i: (i, 0)),  # x tile (double-buffered)
                const_spec((d_in, d_h)),                     # w0
                const_spec((1, d_h)),                        # b0
                const_spec((d_h, d_h)),                      # w1
                const_spec((1, d_h)),                        # b1
                const_spec((d_h, d_out)),                    # w2
                const_spec((1, d_out)),                      # b2
            ],
            out_specs=pl.BlockSpec((bb, d_out), lambda i: (i, 0)),
        ),
        compiler_params=pltpu.CompilerParams(
            dimension_semantics=("parallel",),
            vmem_limit_bytes=vmem_limit,
        ),
    )(xp, w0p, b0p, w1p, b1p, w2p, b2p)

    # Skip the extra slice (and its HBM pass) when no padding was actually added.
    if b_pad == B and d_out == num_classes:
        return out
    return out[:B, :num_classes]


def init_params(key, input_dim, num_classes, num_units):
    """PyTorch nn.Linear-style init (uniform +-1/sqrt(fan_in)); weights stored as
    (in_features, out_features), biases as (1, out_features)."""
    ks = jax.random.split(key, 6)

    def linear(kw, kb, fan_in, fan_out):
        bound = 1.0 / jnp.sqrt(jnp.float32(fan_in))
        w = jax.random.uniform(kw, (fan_in, fan_out), jnp.float32, -bound, bound)
        b = jax.random.uniform(kb, (1, fan_out), jnp.float32, -bound, bound)
        return w, b

    w0, b0 = linear(ks[0], ks[1], input_dim, num_units)
    w1, b1 = linear(ks[2], ks[3], num_units, num_units)
    w2, b2 = linear(ks[4], ks[5], num_units, num_classes)
    return w0, b0, w1, b1, w2, b2


def mlp_reference(x, w0, b0, w1, b1, w2, b2):
    x = x.astype(jnp.float32)
    h0 = jnp.maximum(x @ w0 + b0, 0.0)
    h1 = jnp.maximum(h0 @ w1 + b1, 0.0)
    return h1 @ w2 + b2


if __name__ == "__main__":
    key = jax.random.PRNGKey(0)
    k_x, k_p = jax.random.split(key)

    batch, input_dim, num_units, num_classes = 8, 32, 16, 4
    x = jax.random.normal(k_x, (batch, input_dim), jnp.float32)
    raw_params = init_params(k_p, input_dim, num_classes, num_units)

    # Weight padding/casting happens ONCE here (not per forward call).
    padded_params, n_cls = prepare_params(*raw_params)

    out = mlp_forward(x, padded_params, n_cls)
    out = jax.block_until_ready(out)

    ref = mlp_reference(x, *raw_params)
    assert out.shape == (batch, num_classes)
    # bf16 MXU operands -> compare against the f32 reference at bf16-level tolerance.
    assert jnp.allclose(out, ref, atol=3e-2, rtol=3e-2), "mismatch vs reference"

    print("KERNEL_OK")
</pallas_src>

<mosaic_0001>
module attributes {stable_mosaic.version = 11 : i64} {
  func.func @mlp_kernel(%arg0: i32, %arg1: memref<8x128xbf16, #tpu.memory_space<vmem>>, %arg2: memref<128x128xbf16, #tpu.memory_space<vmem>>, %arg3: memref<1x128xf32, #tpu.memory_space<vmem>>, %arg4: memref<128x128xbf16, #tpu.memory_space<vmem>>, %arg5: memref<1x128xf32, #tpu.memory_space<vmem>>, %arg6: memref<128x128xbf16, #tpu.memory_space<vmem>>, %arg7: memref<1x128xf32, #tpu.memory_space<vmem>>, %arg8: memref<8x128xf32, #tpu.memory_space<vmem>>) attributes {dimension_semantics = [#tpu.dimension_semantics<parallel>], iteration_bounds = array<i64: 1>, scalar_prefetch = 0 : i64, scratch_operands = 0 : i64, tpu.core_type = #tpu.core_type<tc>, window_params = [{transform_indices = @transform_0, window_bounds = array<i64: 8, 128>}, {pipeline_mode = #tpu.pipeline_mode<synchronous>, transform_indices = @transform_1, window_bounds = array<i64: 128, 128>}, {pipeline_mode = #tpu.pipeline_mode<synchronous>, transform_indices = @transform_2, window_bounds = array<i64: 1, 128>}, {pipeline_mode = #tpu.pipeline_mode<synchronous>, transform_indices = @transform_3, window_bounds = array<i64: 128, 128>}, {pipeline_mode = #tpu.pipeline_mode<synchronous>, transform_indices = @transform_4, window_bounds = array<i64: 1, 128>}, {pipeline_mode = #tpu.pipeline_mode<synchronous>, transform_indices = @transform_5, window_bounds = array<i64: 128, 128>}, {pipeline_mode = #tpu.pipeline_mode<synchronous>, transform_indices = @transform_6, window_bounds = array<i64: 1, 128>}, {transform_indices = @transform_7, window_bounds = array<i64: 8, 128>}]} {
    %c0 = arith.constant 0 : index
    %c0_0 = arith.constant 0 : index
    %0 = vector.load %arg1[%c0, %c0_0] : memref<8x128xbf16, #tpu.memory_space<vmem>>, vector<8x128xbf16>
    %c0_1 = arith.constant 0 : index
    %c0_2 = arith.constant 0 : index
    %1 = vector.load %arg2[%c0_1, %c0_2] : memref<128x128xbf16, #tpu.memory_space<vmem>>, vector<128x128xbf16>
    %cst = arith.constant dense<0.000000e+00> : vector<8x128xf32>
    %2 = tpu.matmul %0, %1, %cst {dimension_numbers = #tpu.dot_dimension_numbers<[1], [0], [0], [1], [0, 0, 1, 1], [], []>} : vector<8x128xbf16>, vector<128x128xbf16>, vector<8x128xf32> -> vector<8x128xf32>
    %c0_3 = arith.constant 0 : index
    %c0_4 = arith.constant 0 : index
    %3 = vector.load %arg3[%c0_3, %c0_4] : memref<1x128xf32, #tpu.memory_space<vmem>>, vector<1x128xf32>
    %4 = vector.broadcast %3 : vector<1x128xf32> to vector<8x128xf32>
    %5 = arith.addf %2, %4 : vector<8x128xf32>
    %cst_5 = arith.constant 0.000000e+00 : f32
    %6 = vector.broadcast %cst_5 : f32 to vector<8x128xf32>
    %7 = arith.maximumf %5, %6 : vector<8x128xf32>
    %8 = arith.truncf %7 : vector<8x128xf32> to vector<8x128xbf16>
    %c0_6 = arith.constant 0 : index
    %c0_7 = arith.constant 0 : index
    %9 = vector.load %arg4[%c0_6, %c0_7] : memref<128x128xbf16, #tpu.memory_space<vmem>>, vector<128x128xbf16>
    %cst_8 = arith.constant dense<0.000000e+00> : vector<8x128xf32>
    %10 = tpu.matmul %8, %9, %cst_8 {dimension_numbers = #tpu.dot_dimension_numbers<[1], [0], [0], [1], [0, 0, 1, 1], [], []>} : vector<8x128xbf16>, vector<128x128xbf16>, vector<8x128xf32> -> vector<8x128xf32>
    %c0_9 = arith.constant 0 : index
    %c0_10 = arith.constant 0 : index
    %11 = vector.load %arg5[%c0_9, %c0_10] : memref<1x128xf32, #tpu.memory_space<vmem>>, vector<1x128xf32>
    %12 = vector.broadcast %11 : vector<1x128xf32> to vector<8x128xf32>
    %13 = arith.addf %10, %12 : vector<8x128xf32>
    %cst_11 = arith.constant 0.000000e+00 : f32
    %14 = vector.broadcast %cst_11 : f32 to vector<8x128xf32>
    %15 = arith.maximumf %13, %14 : vector<8x128xf32>
    %16 = arith.truncf %15 : vector<8x128xf32> to vector<8x128xbf16>
    %c0_12 = arith.constant 0 : index
    %c0_13 = arith.constant 0 : index
    %17 = vector.load %arg6[%c0_12, %c0_13] : memref<128x128xbf16, #tpu.memory_space<vmem>>, vector<128x128xbf16>
    %cst_14 = arith.constant dense<0.000000e+00> : vector<8x128xf32>
    %18 = tpu.matmul %16, %17, %cst_14 {dimension_numbers = #tpu.dot_dimension_numbers<[1], [0], [0], [1], [0, 0, 1, 1], [], []>} : vector<8x128xbf16>, vector<128x128xbf16>, vector<8x128xf32> -> vector<8x128xf32>
    %c0_15 = arith.constant 0 : index
    %c0_16 = arith.constant 0 : index
    %19 = vector.load %arg7[%c0_15, %c0_16] : memref<1x128xf32, #tpu.memory_space<vmem>>, vector<1x128xf32>
    %20 = vector.broadcast %19 : vector<1x128xf32> to vector<8x128xf32>
    %21 = arith.addf %18, %20 : vector<8x128xf32>
    %c0_17 = arith.constant 0 : index
    %c0_18 = arith.constant 0 : index
    %22 = vector.load %arg8[%c0_17, %c0_18] : memref<8x128xf32, #tpu.memory_space<vmem>>, vector<8x128xf32>
    tpu.vector_store %arg8[%c0_17, %c0_18], %21 {strides = array<i32>} : memref<8x128xf32, #tpu.memory_space<vmem>>, vector<8x128xf32>,
    return
  }
  func.func @transform_0(%arg0: i32) -> (i32, i32) {
    %c0_i32 = arith.constant 0 : i32
    %c0_i32_0 = arith.constant 0 : i32
    return %arg0, %c0_i32 : i32, i32
  }
  func.func @transform_1(%arg0: i32) -> (i32, i32) {
    %c0_i32 = arith.constant 0 : i32
    %c0_i32_0 = arith.constant 0 : i32
    %c0_i32_1 = arith.constant 0 : i32
    return %c0_i32, %c0_i32_0 : i32, i32
  }
  func.func @transform_2(%arg0: i32) -> (i32, i32) {
    %c0_i32 = arith.constant 0 : i32
    %c0_i32_0 = arith.constant 0 : i32
    %c0_i32_1 = arith.constant 0 : i32
    return %c0_i32, %c0_i32_0 : i32, i32
  }
  func.func @transform_3(%arg0: i32) -> (i32, i32) {
    %c0_i32 = arith.constant 0 : i32
    %c0_i32_0 = arith.constant 0 : i32
    %c0_i32_1 = arith.constant 0 : i32
    return %c0_i32, %c0_i32_0 : i32, i32
  }
  func.func @transform_4(%arg0: i32) -> (i32, i32) {
    %c0_i32 = arith.constant 0 : i32
    %c0_i32_0 = arith.constant 0 : i32
    %c0_i32_1 = arith.constant 0 : i32
    return %c0_i32, %c0_i32_0 : i32, i32
  }
  func.func @transform_5(%arg0: i32) -> (i32, i32) {
    %c0_i32 = arith.constant 0 : i32
    %c0_i32_0 = arith.constant 0 : i32
    %c0_i32_1 = arith.constant 0 : i32
    return %c0_i32, %c0_i32_0 : i32, i32
  }
  func.func @transform_6(%arg0: i32) -> (i32, i32) {
    %c0_i32 = arith.constant 0 : i32
    %c0_i32_0 = arith.constant 0 : i32
    %c0_i32_1 = arith.constant 0 : i32
    return %c0_i32, %c0_i32_0 : i32, i32
  }
  func.func @transform_7(%arg0: i32) -> (i32, i32) {
    %c0_i32 = arith.constant 0 : i32
    %c0_i32_0 = arith.constant 0 : i32
    return %arg0, %c0_i32 : i32, i32
  }
}

</mosaic_0001>

<bundles_post_ra>
// kernel: mlp_forward.1
= control target key start
LH: loop header
LB: loop body
LE: loop exit
PB: predicated region body
PF: predicated region fallthrough
CT: control target
= control target key end

     0   :  { %12 = vsyncpa [#allocation3], 0  ;;  %s601_s0 = inlined_call_operand.vmem [shape: bf16[8,128], index: 0, kind: input, shape index: {}]   ;;  %s602_s1 = inlined_call_operand.hbm [shape: bf16[128,128], index: 1, kind: input, shape index: {}]   ;;  %s603_s2 = inlined_call_operand.vmem [shape: f32[1,128], index: 2, kind: input, shape index: {}]   ;;  %s604_s3 = inlined_call_operand.hbm [shape: bf16[128,128], index: 3, kind: input, shape index: {}]   ;;  %s605_s4 = inlined_call_operand.vmem [shape: f32[1,128], index: 4, kind: input, shape index: {}]   ;;  %s606_s5 = inlined_call_operand.hbm [shape: bf16[128,128], index: 5, kind: input, shape index: {}]   ;;  %s607_s6 = inlined_call_operand.vmem [shape: f32[1,128], index: 6, kind: input, shape index: {}]   ;;  %s608_s7 = inlined_call_operand.vmem [shape: f32[8,128], index: 7, kind: output, shape index: {}]  }
   0x1   :  { %13 = vsyncpa [#allocation5], 0  ;;  %s35_s26 = sshll.u32 %s604_s3, 4  ;;  %s532_s27 = smov [#allocation4]   ;;  %s36_s26 = int_to_ptr.hbm [resolvable:$true] %s35_s26 }
   0x2   :  { %s37_s28 = sshll.u32 %s532_s27, 4  ;;  %s20_s8 = sshll.u32 %s602_s1, 4  ;;  %s38_s28 = int_to_ptr.vmem [resolvable:$true] %s37_s28  ;;  %s21_s8 = int_to_ptr.hbm [resolvable:$true] %s20_s8 }
   0x3   :  { %s533_s9 = smov 64   ;;  %s534_s10 = smov 4  }
   0x4   :  { %43 = dma.hbm_to_vmem [thread:$0]  %s36_s26, 1024, %s38_s28, [#allocation5], %s533_s9, %s533_s9, %s534_s10  }
   0x5   :  { %s535_s11 = smov [#allocation2]   ;;  %s50_s15 = sshll.u32 %s606_s5, 4  ;;  %s51_s15 = int_to_ptr.hbm [resolvable:$true] %s50_s15 }
   0x6   :  { %s22_s12 = sshll.u32 %s535_s11, 4  ;;  %s536_s3 = smov [#allocation6]   ;;  %s23_s12 = int_to_ptr.vmem [resolvable:$true] %s22_s12 }
   0x7   :  { %28 = dma.hbm_to_vmem [thread:$0]  %s21_s8, 1024, %s23_s12, [#allocation3], %s533_s9, %s533_s9, %s534_s10  }
   0x8   :  { %s52_s16 = sshll.u32 %s536_s3, 4  ;;  %s53_s16 = int_to_ptr.vmem [resolvable:$true] %s52_s16 }
   0x9   :  { %58 = dma.hbm_to_vmem [thread:$0]  %s51_s15, 1024, %s53_s16, [#allocation5], %s533_s9, %s533_s9, %s534_s10  }
   0xa   :  { %528 = dma.done.wait [#allocation3], 1024  }
   0xb   :  { %529 = vsyncadd [#allocation3], 4294966272 }
   0xc   :  { %530 = dma.done.wait [#allocation5], 2048  }
   0xd   :  { %531 = vsyncadd [#allocation5], 4294965248  ;;  %v431_v0 = vld [vmem:[#allocation2 + $0x38] sm:$0xff]  ;;  %v430_v1 = vld [vmem:[#allocation2 + $0x30] sm:$0xff] }
   0xe   :  { %142 = vmatpush.bf16.msra.mxu0 %v431_v0  ;;  %v439_v2 = vld [vmem:[#allocation4 + $0x38] sm:$0xff]  ;;  %v438_v3 = vld [vmem:[#allocation4 + $0x30] sm:$0xff]  ;;  %v429_v4 = vld [vmem:[#allocation2 + $0x28] sm:$0xff] }
   0xf   :  { %225 = vmatpush.bf16.msra.mxu1 %v439_v2  ;;  %v437_v5 = vld [vmem:[#allocation4 + $0x28] sm:$0xff]  ;;  %v428_v6 = vld [vmem:[#allocation2 + $0x20] sm:$0xff]  ;;  %v427_v8 = vld [vmem:[#allocation2 + $0x18] sm:$0xff] }
  0x10   :  { %v436_v7 = vld [vmem:[#allocation4 + $0x20] sm:$0xff]  ;;  %v435_v9 = vld [vmem:[#allocation4 + $0x18] sm:$0xff]  ;;  %v426_v10 = vld [vmem:[#allocation2 + $0x10] sm:$0xff] }
  0x11   :  { %v434_v11 = vld [vmem:[#allocation4 + $0x10] sm:$0xff]  ;;  %v425_v12 = vld [vmem:[#allocation2 + $0x8] sm:$0xff]  ;;  %v424_v13 = vld [vmem:[#allocation2] sm:$0xff] }
  0x12   :  { %143 = vmatpush.bf16.msra.mxu0 %v430_v1  ;;  %v73_v14 = vld [vmem:[%s601_s0] sm:$0xf]  ;;  %v433_v15 = vld [vmem:[#allocation4 + $0x8] sm:$0xff]  ;;  %v447_v17 = vld [vmem:[#allocation6 + $0x38] sm:$0xff] }
  0x13   :  { %226 = vmatpush.bf16.msra.mxu1 %v438_v3  ;;  %v432_v16 = vld [vmem:[#allocation4] sm:$0xff]  ;;  %308 = vmatpush.bf16.msra.mxu2 %v447_v17  ;;  %v446_v18 = vld [vmem:[#allocation6 + $0x30] sm:$0xff]  ;;  %v445_v19 = vld [vmem:[#allocation6 + $0x28] sm:$0xff] }
  0x14   :  { %v444_v20 = vld [vmem:[#allocation6 + $0x20] sm:$0xff]  ;;  %v443_v21 = vld [vmem:[#allocation6 + $0x18] sm:$0xff]  ;;  %v442_v22 = vld [vmem:[#allocation6 + $0x10] sm:$0xff] }
  0x15   :  { %v453_v23 = vld [vmem:[%s603_s2] ss:$0 sm:$0xff]  ;;  %v441_v29 = vld [vmem:[#allocation6 + $0x8] sm:$0xff] }
  0x16   :  { %144 = vmatpush.bf16.msra.mxu0 %v429_v4  ;;  %v440_v30 = vld [vmem:[#allocation6] sm:$0xff] }
  0x17   :  { %227 = vmatpush.bf16.msra.mxu1 %v437_v5  ;;  %309 = vmatpush.bf16.msra.mxu2 %v446_v18  ;;  %v454_v31 = vld [vmem:[%s605_s4] ss:$0 sm:$0xff] }
  0x18   :  { %v455_v37 = vld [vmem:[%s607_s6] ss:$0 sm:$0xff] }
  0x1a   :  { %145 = vmatpush.bf16.msra.mxu0 %v428_v6 }
  0x1b   :  { %228 = vmatpush.bf16.msra.mxu1 %v436_v7  ;;  %310 = vmatpush.bf16.msra.mxu2 %v445_v19 }
  0x1e   :  { %146 = vmatpush.bf16.msra.mxu0 %v427_v8 }
  0x1f   :  { %229 = vmatpush.bf16.msra.mxu1 %v435_v9  ;;  %311 = vmatpush.bf16.msra.mxu2 %v444_v20 }
  0x22   :  { %147 = vmatpush.bf16.msra.mxu0 %v426_v10 }
  0x23   :  { %230 = vmatpush.bf16.msra.mxu1 %v434_v11  ;;  %312 = vmatpush.bf16.msra.mxu2 %v443_v21 }
  0x26   :  { %148 = vmatpush.bf16.msra.mxu0 %v425_v12 }
  0x27   :  { %231 = vmatpush.bf16.msra.mxu1 %v433_v15  ;;  %313 = vmatpush.bf16.msra.mxu2 %v442_v22 }
  0x2a   :  { %149 = vmatpush.bf16.msra.mxu0 %v424_v13 }
  0x2b   :  { %232 = vmatpush.bf16.msra.mxu1 %v432_v16  ;;  %314 = vmatpush.bf16.msra.mxu2 %v441_v29 }
  0x2d   :  { %150 = vmatmul.bf16.vlgmr.msra.gmra.mxu0 %v73_v14 }
  0x2f   :  { %315 = vmatpush.bf16.msra.mxu2 %v440_v30 }
  0xaa   :  { %v151_v24 = vpop.f32.mrf.mxu0 }
  0xab   :  { %v152_v25 = vadd.f32 %v453_v23, %v151_v24 }
  0xad   :  { %v155_v26 = vmax.f32 %v152_v25, 0.0 }
  0xaf   :  { %v156_v27 = vpack.c.bf16 %v155_v26, %v155_v26 }
  0xb1   :  { %233 = vmatmul.bf16.vlgmr.msra.gmra.mxu1 %v156_v27 }
  0xb2   :  { %v153_v28 = vpop.f32.mrf.mxu0 }
 0x12e   :  { %v234_v32 = vpop.f32.mrf.mxu1 }
 0x12f   :  { %v235_v33 = vadd.f32 %v454_v31, %v234_v32 }
 0x131   :  { %v238_v34 = vmax.f32 %v235_v33, 0.0 }
 0x133   :  { %v239_v35 = vpack.c.bf16 %v238_v34, %v238_v34 }
 0x135   :  { %316 = vmatmul.bf16.vlgmr.msra.gmra.mxu2 %v239_v35 }
 0x136   :  { %v236_v36 = vpop.f32.mrf.mxu1 }
 0x1b8   :  { %v317_v38 = vpop.f32.mrf.mxu2 }
 0x1b9   :  { %v318_v39 = vadd.f32 %v455_v37, %v317_v38 }
 0x1bb   :  { %321 = vst [vmem:[%s608_s7] sm:$0xff] %v318_v39 }
 0x1c0   :  { %v319_v40 = vpop.f32.mrf.mxu2 }
 0x1c1   :  { %326 = vsyncpa [#allocation3], 1 }
 0x1c2   :  { %327 = vsyncpa [#allocation5], 1 }

</bundles_post_ra>
